<compile_context>
chip_gen: v6e
topology: v6e:2x2x1
jax: 0.10.0
libtpu: 0.0.40
codegen_flags: <defaults>
</compile_context>

<pallas_src>
from functools import partial

import jax
import jax.numpy as jnp
import numpy as np
from jax.experimental import pallas as pl
from jax.experimental.pallas import tpu as pltpu


def _round_up(x, m):
    return ((x + m - 1) // m) * m


def _cdiv(a, b):
    return (a + b - 1) // b


def _make_spec(shape, index_map, buffers=None):
    """BlockSpec with optional N-deep buffering; falls back if unsupported."""
    if buffers is not None:
        try:
            return pl.BlockSpec(shape, index_map, pipeline_mode=pl.Buffered(buffers))
        except TypeError:
            pass
    return pl.BlockSpec(shape, index_map)


# ---------------------------------------------------------------------------
# Kernel
# ---------------------------------------------------------------------------
def _decoder_kernel(latent_ref, w1_ref, b1_ref, w2_ref, b2_ref, w3_ref, b3_ref,
                    thresh_ref, out_ref, h_ref):
    j = pl.program_id(1)

    # Hidden activations are computed once per batch tile (column axis is the
    # fastest, "arbitrary" grid axis) and cached in bf16 VMEM scratch so every
    # w3 column tile reuses them.
    @pl.when(j == 0)
    def _():
        x = latent_ref[...]                                              # (TB, n_in_pad) bf16
        h = jnp.dot(x, w1_ref[...], preferred_element_type=jnp.float32) + b1_ref[...]
        h = jnp.maximum(h, 0.0)
        h = jnp.dot(h.astype(w2_ref.dtype), w2_ref[...],
                    preferred_element_type=jnp.float32) + b2_ref[...]
        h = jnp.maximum(h, 0.0)
        h_ref[...] = h.astype(h_ref.dtype)                               # (TB, n_hidden_pad) bf16

    z = jnp.dot(h_ref[...], w3_ref[...],
                preferred_element_type=jnp.float32) + b3_ref[...]        # (TB, TN) f32

    # _get_full_mask: valid columns are the contiguous prefix
    # col < lengths*set_channels (threshold precomputed in the wrapper).
    col = j * out_ref.shape[-1] + jax.lax.broadcasted_iota(jnp.int32, z.shape, 1)
    out_ref[...] = jnp.where(col < thresh_ref[...], z, 0.0).astype(out_ref.dtype)


# ---------------------------------------------------------------------------
# One-time weight preparation (cache the result across forward calls)
# ---------------------------------------------------------------------------
def prepare_mlp_decoder_params(params, *, set_channels, max_batch_len, lane=128):
    w1, b1, w2, b2, w3, b3 = params
    n_in, n_hidden = w1.shape
    n_out = w3.shape[1]
    out_cols = max_batch_len * set_channels
    assert out_cols <= n_out, "max_batch_len*set_channels exceeds decoder output width"
    assert w2.shape == (n_hidden, n_hidden) and w3.shape[0] == n_hidden

    n_in_pad = _round_up(n_in, lane)
    n_hidden_pad = _round_up(n_hidden, lane)

    # Column tile TN for w3/out: keep the (n_hidden_pad, TN) bf16 tile within a
    # ~8 MiB budget so very wide configs still fit v7x's 64 MiB VMEM.
    n_out_pad0 = _round_up(out_cols, lane)
    max_tn = max(lane, ((8 << 20) // (2 * n_hidden_pad)) // lane * lane)
    n_col_tiles = _cdiv(n_out_pad0, max_tn)
    tn = _round_up(_cdiv(n_out_pad0, n_col_tiles), lane)
    n_out_pad = tn * n_col_tiles

    w1p = jnp.pad(w1, ((0, n_in_pad - n_in), (0, n_hidden_pad - n_hidden))).astype(jnp.bfloat16)
    w2p = jnp.pad(w2, ((0, n_hidden_pad - n_hidden),
                       (0, n_hidden_pad - n_hidden))).astype(jnp.bfloat16)
    w3p = jnp.pad(w3[:, :out_cols],
                  ((0, n_hidden_pad - n_hidden), (0, n_out_pad - out_cols))).astype(jnp.bfloat16)
    b1p = jnp.pad(b1.reshape(1, -1), ((0, 0), (0, n_hidden_pad - n_hidden))).astype(jnp.float32)
    b2p = jnp.pad(b2.reshape(1, -1), ((0, 0), (0, n_hidden_pad - n_hidden))).astype(jnp.float32)
    b3p = jnp.pad(b3.reshape(1, -1)[:, :out_cols],
                  ((0, 0), (0, n_out_pad - out_cols))).astype(jnp.float32)

    return dict(
        w1=w1p, b1=b1p, w2=w2p, b2=b2p, w3=w3p, b3=b3p,
        n_in=n_in, n_in_pad=n_in_pad, n_hidden_pad=n_hidden_pad,
        out_cols=out_cols, n_out_pad=n_out_pad, tn=tn, n_col_tiles=n_col_tiles,
        set_channels=set_channels, max_batch_len=max_batch_len,
    )


# ---------------------------------------------------------------------------
# Forward
# ---------------------------------------------------------------------------
def mlp_decoder_forward(latent, mask, prep, *, out_dtype=jnp.float32, tb_max=512):
    """Pallas implementation of MLPDecoder.forward(latent, max_batch_len, mask)."""
    B, n_in = latent.shape
    assert n_in == prep["n_in"]

    n_in_pad = prep["n_in_pad"]
    n_hidden_pad = prep["n_hidden_pad"]
    n_out_pad = prep["n_out_pad"]
    TN = prep["tn"]
    n_col_tiles = prep["n_col_tiles"]

    # Padding-aware, 16-aligned batch tiling; ensure >=2 batch tiles (when B
    # permits) so v7x's second TensorCore is not idle on the "parallel" axis.
    n_b_tiles = _cdiv(B, tb_max)
    if n_b_tiles == 1 and B > 16:
        n_b_tiles = 2
    TB = _round_up(_cdiv(B, n_b_tiles), 16)
    B_pad = TB * n_b_tiles

    latent_p = jnp.pad(latent, ((0, B_pad - B), (0, n_in_pad - n_in))).astype(jnp.bfloat16)

    # Per-row prefix threshold = mask.sum() * set_channels (no in-kernel XLU
    # reduction); matches the original _get_full_mask semantics.
    thresh = (jnp.sum(mask.astype(jnp.int32), axis=1)
              * prep["set_channels"]).astype(jnp.int32)
    thresh = jnp.pad(thresh, (0, B_pad - B)).reshape(B_pad, 1)

    grid = (n_b_tiles, n_col_tiles)

    # Single-buffer the VMEM-resident weights/biases (constant index maps);
    # w3/b3 stay single-buffered only when there is a single column tile.
    in_specs = [
        pl.BlockSpec((TB, n_in_pad), lambda i, j: (i, 0)),                       # latent
        _make_spec((n_in_pad, n_hidden_pad), lambda i, j: (0, 0), buffers=1),    # w1
        _make_spec((1, n_hidden_pad), lambda i, j: (0, 0), buffers=1),           # b1
        _make_spec((n_hidden_pad, n_hidden_pad), lambda i, j: (0, 0), buffers=1),# w2
        _make_spec((1, n_hidden_pad), lambda i, j: (0, 0), buffers=1),           # b2
        _make_spec((n_hidden_pad, TN), lambda i, j: (0, j),
                   buffers=1 if n_col_tiles == 1 else None),                     # w3
        _make_spec((1, TN), lambda i, j: (0, j),
                   buffers=1 if n_col_tiles == 1 else None),                     # b3
        pl.BlockSpec((TB, 1), lambda i, j: (i, 0)),                              # thresh
    ]
    out_spec = pl.BlockSpec((TB, TN), lambda i, j: (i, j))

    # VMEM budget (for vmem_limit_bytes), derived from the actual footprint.
    out_isz = jnp.dtype(out_dtype).itemsize
    w_bytes = (prep["w1"].nbytes + prep["w2"].nbytes
               + prep["b1"].nbytes + prep["b2"].nbytes)
    w3_bufs = 1 if n_col_tiles == 1 else 2
    w_bytes += w3_bufs * (n_hidden_pad * TN * 2 + TN * 4)
    a_bytes = 2 * (TB * n_in_pad * 2 + TB * 4 + TB * TN * out_isz)
    s_bytes = TB * n_hidden_pad * 2
    est = w_bytes + a_bytes + s_bytes
    vmem_limit = int(min(max(est * 3 // 2 + (2 << 20), 32 << 20), 64 << 20))

    flops = 2 * B_pad * (n_in_pad * n_hidden_pad
                         + n_hidden_pad * n_hidden_pad
                         + n_hidden_pad * n_out_pad)
    bytes_accessed = (latent_p.nbytes + thresh.nbytes
                      + prep["w1"].nbytes + prep["w2"].nbytes + prep["w3"].nbytes
                      + prep["b1"].nbytes + prep["b2"].nbytes + prep["b3"].nbytes
                      + B_pad * n_out_pad * out_isz)

    out = pl.pallas_call(
        _decoder_kernel,
        out_shape=jax.ShapeDtypeStruct((B_pad, n_out_pad), out_dtype),
        grid_spec=pltpu.PrefetchScalarGridSpec(
            num_scalar_prefetch=0,
            grid=grid,
            in_specs=in_specs,
            out_specs=out_spec,
            scratch_shapes=[pltpu.VMEM((TB, n_hidden_pad), jnp.bfloat16)],
        ),
        compiler_params=pltpu.CompilerParams(
            dimension_semantics=("parallel", "arbitrary"),
            vmem_limit_bytes=vmem_limit),
        cost_estimate=pl.CostEstimate(flops=flops, transcendentals=0,
                                      bytes_accessed=bytes_accessed),
    )(latent_p, prep["w1"], prep["b1"], prep["w2"], prep["b2"],
      prep["w3"], prep["b3"], thresh)

    out = out[:B, :prep["out_cols"]].astype(jnp.float32)
    return out.reshape(B, prep["max_batch_len"], prep["set_channels"])


# ---------------------------------------------------------------------------
# Pure-JAX reference (same bf16-matmul / f32-elementwise math)
# ---------------------------------------------------------------------------
def _reference_forward(latent, mask, params, *, set_channels, max_batch_len):
    w1, b1, w2, b2, w3, b3 = params

    def mm(a, w):
        return jnp.dot(a.astype(jnp.bfloat16), w.astype(jnp.bfloat16),
                       preferred_element_type=jnp.float32)

    h = jnp.maximum(mm(latent, w1) + b1, 0.0)
    h = jnp.maximum(mm(h, w2) + b2, 0.0)
    z = mm(h, w3) + b3
    z = z.reshape(latent.shape[0], -1, set_channels)[:, :max_batch_len, :]
    lengths = mask.sum(axis=1)
    idx = jnp.arange(max_batch_len)[None, :, None]
    full_mask = (idx < lengths[:, None, None]).astype(z.dtype)
    return full_mask * z


if __name__ == "__main__":
    # Small, self-consistent shapes.
    B = 2                 # batch
    n_in = 32             # latent dim
    n_hidden = 32         # MLP width
    set_channels = 4
    set_len = 16          # n_out / set_channels
    n_out = set_len * set_channels
    max_batch_len = 8
    num_layers = 3

    key = jax.random.PRNGKey(0)
    k_lat, k1, k2, k3, kb1, kb2, kb3 = jax.random.split(key, 7)

    latent = jax.random.normal(k_lat, (B, n_in), dtype=jnp.float32)

    # Deterministic parameter init (weights stored as (in, out)).
    w1 = 0.1 * jax.random.normal(k1, (n_in, n_hidden), dtype=jnp.float32)
    b1 = 0.1 * jax.random.normal(kb1, (1, n_hidden), dtype=jnp.float32)
    w2 = 0.1 * jax.random.normal(k2, (n_hidden, n_hidden), dtype=jnp.float32)
    b2 = 0.1 * jax.random.normal(kb2, (1, n_hidden), dtype=jnp.float32)
    w3 = 0.1 * jax.random.normal(k3, (n_hidden, n_out), dtype=jnp.float32)
    b3 = 0.1 * jax.random.normal(kb3, (1, n_out), dtype=jnp.float32)
    params = (w1, b1, w2, b2, w3, b3)

    # 0/1 validity mask per example (lengths 5 and 8).
    lengths = np.array([5, 8], dtype=np.int32)
    mask_np = np.zeros((B, max_batch_len), dtype=np.int32)
    for i, L in enumerate(lengths):
        mask_np[i, :L] = 1
    mask = jnp.asarray(mask_np)

    # One-time (cached) weight prep; reuse across calls.
    prep = prepare_mlp_decoder_params(params, set_channels=set_channels,
                                      max_batch_len=max_batch_len)
    fwd = jax.jit(partial(mlp_decoder_forward, prep=prep))

    out = jax.block_until_ready(fwd(latent, mask))

    ref = _reference_forward(latent, mask, params,
                             set_channels=set_channels,
                             max_batch_len=max_batch_len)
    np.testing.assert_allclose(np.asarray(out), np.asarray(ref),
                               rtol=1e-3, atol=1e-3)

    assert out.shape == (B, max_batch_len, set_channels)
    print("KERNEL_OK")
</pallas_src>

<mosaic_0001>
module attributes {stable_mosaic.version = 11 : i64} {
  func.func @_decoder_kernel(%arg0: i32, %arg1: i32, %arg2: memref<16x128xbf16, #tpu.memory_space<vmem>>, %arg3: memref<128x128xbf16, #tpu.memory_space<vmem>>, %arg4: memref<1x128xf32, #tpu.memory_space<vmem>>, %arg5: memref<128x128xbf16, #tpu.memory_space<vmem>>, %arg6: memref<1x128xf32, #tpu.memory_space<vmem>>, %arg7: memref<128x128xbf16, #tpu.memory_space<vmem>>, %arg8: memref<1x128xf32, #tpu.memory_space<vmem>>, %arg9: memref<16x1xi32, #tpu.memory_space<vmem>>, %arg10: memref<16x128xf32, #tpu.memory_space<vmem>>, %arg11: memref<16x128xbf16, #tpu.memory_space<vmem>>) attributes {dimension_semantics = [#tpu.dimension_semantics<parallel>, #tpu.dimension_semantics<arbitrary>], iteration_bounds = array<i64: 1, 1>, scalar_prefetch = 0 : i64, scratch_operands = 1 : i64, tpu.core_type = #tpu.core_type<tc>, window_params = [{transform_indices = @transform_0, window_bounds = array<i64: 16, 128>}, {pipeline_mode = #tpu.pipeline_mode<synchronous>, transform_indices = @transform_1, window_bounds = array<i64: 128, 128>}, {pipeline_mode = #tpu.pipeline_mode<synchronous>, transform_indices = @transform_2, window_bounds = array<i64: 1, 128>}, {pipeline_mode = #tpu.pipeline_mode<synchronous>, transform_indices = @transform_3, window_bounds = array<i64: 128, 128>}, {pipeline_mode = #tpu.pipeline_mode<synchronous>, transform_indices = @transform_4, window_bounds = array<i64: 1, 128>}, {pipeline_mode = #tpu.pipeline_mode<synchronous>, transform_indices = @transform_5, window_bounds = array<i64: 128, 128>}, {pipeline_mode = #tpu.pipeline_mode<synchronous>, transform_indices = @transform_6, window_bounds = array<i64: 1, 128>}, {transform_indices = @transform_7, window_bounds = array<i64: 16, 1>}, {transform_indices = @transform_8, window_bounds = array<i64: 16, 128>}]} {
    %c0_i32 = arith.constant 0 : i32
    %0 = arith.cmpi eq, %arg1, %c0_i32 : i32
    %1 = arith.extui %0 : i1 to i32
    %c0_i32_0 = arith.constant 0 : i32
    %2 = arith.cmpi ne, %1, %c0_i32_0 : i32
    scf.if %2 {
      %c0_11 = arith.constant 0 : index
      %c0_12 = arith.constant 0 : index
      %19 = vector.load %arg2[%c0_11, %c0_12] : memref<16x128xbf16, #tpu.memory_space<vmem>>, vector<16x128xbf16>
      %c0_13 = arith.constant 0 : index
      %c0_14 = arith.constant 0 : index
      %20 = vector.load %arg3[%c0_13, %c0_14] : memref<128x128xbf16, #tpu.memory_space<vmem>>, vector<128x128xbf16>
      %cst_15 = arith.constant dense<0.000000e+00> : vector<16x128xf32>
      %21 = tpu.matmul %19, %20, %cst_15 {dimension_numbers = #tpu.dot_dimension_numbers<[1], [0], [0], [1], [0, 0, 1, 1], [], []>} : vector<16x128xbf16>, vector<128x128xbf16>, vector<16x128xf32> -> vector<16x128xf32>
      %c0_16 = arith.constant 0 : index
      %c0_17 = arith.constant 0 : index
      %22 = vector.load %arg4[%c0_16, %c0_17] : memref<1x128xf32, #tpu.memory_space<vmem>>, vector<1x128xf32>
      %23 = vector.broadcast %22 : vector<1x128xf32> to vector<16x128xf32>
      %24 = arith.addf %21, %23 : vector<16x128xf32>
      %cst_18 = arith.constant 0.000000e+00 : f32
      %25 = vector.broadcast %cst_18 : f32 to vector<16x128xf32>
      %26 = arith.maximumf %24, %25 : vector<16x128xf32>
      %27 = arith.truncf %26 : vector<16x128xf32> to vector<16x128xbf16>
      %c0_19 = arith.constant 0 : index
      %c0_20 = arith.constant 0 : index
      %28 = vector.load %arg5[%c0_19, %c0_20] : memref<128x128xbf16, #tpu.memory_space<vmem>>, vector<128x128xbf16>
      %cst_21 = arith.constant dense<0.000000e+00> : vector<16x128xf32>
      %29 = tpu.matmul %27, %28, %cst_21 {dimension_numbers = #tpu.dot_dimension_numbers<[1], [0], [0], [1], [0, 0, 1, 1], [], []>} : vector<16x128xbf16>, vector<128x128xbf16>, vector<16x128xf32> -> vector<16x128xf32>
      %c0_22 = arith.constant 0 : index
      %c0_23 = arith.constant 0 : index
      %30 = vector.load %arg6[%c0_22, %c0_23] : memref<1x128xf32, #tpu.memory_space<vmem>>, vector<1x128xf32>
      %31 = vector.broadcast %30 : vector<1x128xf32> to vector<16x128xf32>
      %32 = arith.addf %29, %31 : vector<16x128xf32>
      %cst_24 = arith.constant 0.000000e+00 : f32
      %33 = vector.broadcast %cst_24 : f32 to vector<16x128xf32>
      %34 = arith.maximumf %32, %33 : vector<16x128xf32>
      %35 = arith.truncf %34 : vector<16x128xf32> to vector<16x128xbf16>
      %c0_25 = arith.constant 0 : index
      %c0_26 = arith.constant 0 : index
      %36 = vector.load %arg11[%c0_25, %c0_26] : memref<16x128xbf16, #tpu.memory_space<vmem>>, vector<16x128xbf16>
      tpu.vector_store %arg11[%c0_25, %c0_26], %35 {strides = array<i32>} : memref<16x128xbf16, #tpu.memory_space<vmem>>, vector<16x128xbf16>,
    } else {
    }
    %c0 = arith.constant 0 : index
    %c0_1 = arith.constant 0 : index
    %3 = vector.load %arg11[%c0, %c0_1] : memref<16x128xbf16, #tpu.memory_space<vmem>>, vector<16x128xbf16>
    %c0_2 = arith.constant 0 : index
    %c0_3 = arith.constant 0 : index
    %4 = vector.load %arg7[%c0_2, %c0_3] : memref<128x128xbf16, #tpu.memory_space<vmem>>, vector<128x128xbf16>
    %cst = arith.constant dense<0.000000e+00> : vector<16x128xf32>
    %5 = tpu.matmul %3, %4, %cst {dimension_numbers = #tpu.dot_dimension_numbers<[1], [0], [0], [1], [0, 0, 1, 1], [], []>} : vector<16x128xbf16>, vector<128x128xbf16>, vector<16x128xf32> -> vector<16x128xf32>
    %c0_4 = arith.constant 0 : index
    %c0_5 = arith.constant 0 : index
    %6 = vector.load %arg8[%c0_4, %c0_5] : memref<1x128xf32, #tpu.memory_space<vmem>>, vector<1x128xf32>
    %7 = vector.broadcast %6 : vector<1x128xf32> to vector<16x128xf32>
    %8 = arith.addf %5, %7 : vector<16x128xf32>
    %c128_i32 = arith.constant 128 : i32
    %9 = arith.muli %arg1, %c128_i32 : i32
    %10 = tpu.iota {dimensions = array<i32: 1>} : vector<16x128xi32>
    %11 = vector.broadcast %9 : i32 to vector<16x128xi32>
    %12 = arith.addi %11, %10 : vector<16x128xi32>
    %c0_6 = arith.constant 0 : index
    %c0_7 = arith.constant 0 : index
    %13 = vector.load %arg9[%c0_6, %c0_7] : memref<16x1xi32, #tpu.memory_space<vmem>>, vector<16x1xi32>
    %14 = vector.broadcast %13 : vector<16x1xi32> to vector<16x128xi32>
    %15 = arith.cmpi slt, %12, %14 : vector<16x128xi32>
    %cst_8 = arith.constant 0.000000e+00 : f32
    %16 = vector.broadcast %cst_8 : f32 to vector<16x128xf32>
    %17 = arith.select %15, %8, %16 : vector<16x128xi1>, vector<16x128xf32>
    %c0_9 = arith.constant 0 : index
    %c0_10 = arith.constant 0 : index
    %18 = vector.load %arg10[%c0_9, %c0_10] : memref<16x128xf32, #tpu.memory_space<vmem>>, vector<16x128xf32>
    tpu.vector_store %arg10[%c0_9, %c0_10], %17 {strides = array<i32>} : memref<16x128xf32, #tpu.memory_space<vmem>>, vector<16x128xf32>,
    return
  }
  func.func @transform_0(%arg0: i32, %arg1: i32) -> (i32, i32) {
    %c0_i32 = arith.constant 0 : i32
    %c0_i32_0 = arith.constant 0 : i32
    return %arg0, %c0_i32 : i32, i32
  }
  func.func @transform_1(%arg0: i32, %arg1: i32) -> (i32, i32) {
    %c0_i32 = arith.constant 0 : i32
    %c0_i32_0 = arith.constant 0 : i32
    %c0_i32_1 = arith.constant 0 : i32
    return %c0_i32, %c0_i32_0 : i32, i32
  }
  func.func @transform_2(%arg0: i32, %arg1: i32) -> (i32, i32) {
    %c0_i32 = arith.constant 0 : i32
    %c0_i32_0 = arith.constant 0 : i32
    %c0_i32_1 = arith.constant 0 : i32
    return %c0_i32, %c0_i32_0 : i32, i32
  }
  func.func @transform_3(%arg0: i32, %arg1: i32) -> (i32, i32) {
    %c0_i32 = arith.constant 0 : i32
    %c0_i32_0 = arith.constant 0 : i32
    %c0_i32_1 = arith.constant 0 : i32
    return %c0_i32, %c0_i32_0 : i32, i32
  }
  func.func @transform_4(%arg0: i32, %arg1: i32) -> (i32, i32) {
    %c0_i32 = arith.constant 0 : i32
    %c0_i32_0 = arith.constant 0 : i32
    %c0_i32_1 = arith.constant 0 : i32
    return %c0_i32, %c0_i32_0 : i32, i32
  }
  func.func @transform_5(%arg0: i32, %arg1: i32) -> (i32, i32) {
    %c0_i32 = arith.constant 0 : i32
    %c0_i32_0 = arith.constant 0 : i32
    return %c0_i32, %arg1 : i32, i32
  }
  func.func @transform_6(%arg0: i32, %arg1: i32) -> (i32, i32) {
    %c0_i32 = arith.constant 0 : i32
    %c0_i32_0 = arith.constant 0 : i32
    return %c0_i32, %arg1 : i32, i32
  }
  func.func @transform_7(%arg0: i32, %arg1: i32) -> (i32, i32) {
    %c0_i32 = arith.constant 0 : i32
    %c0_i32_0 = arith.constant 0 : i32
    return %arg0, %c0_i32 : i32, i32
  }
  func.func @transform_8(%arg0: i32, %arg1: i32) -> (i32, i32) {
    %c0_i32 = arith.constant 0 : i32
    return %arg0, %arg1 : i32, i32
  }
}

</mosaic_0001>

<bundles_post_ra>
// kernel: mlp_decoder_forward.1
= control target key start
LH: loop header
LB: loop body
LE: loop exit
PB: predicated region body
PF: predicated region fallthrough
CT: control target
= control target key end

     0   :  { %13 = vsyncpa [#allocation4], 0  ;;  %s807_s0 = inlined_call_operand.vmem [shape: bf16[16,128], index: 0, kind: input, shape index: {}]   ;;  %s808_s1 = inlined_call_operand.hbm [shape: bf16[128,128], index: 1, kind: input, shape index: {}]   ;;  %s809_s2 = inlined_call_operand.vmem [shape: f32[1,128], index: 2, kind: input, shape index: {}]   ;;  %s810_s3 = inlined_call_operand.hbm [shape: bf16[128,128], index: 3, kind: input, shape index: {}]   ;;  %s811_s4 = inlined_call_operand.vmem [shape: f32[1,128], index: 4, kind: input, shape index: {}]   ;;  %s812_s5 = inlined_call_operand.hbm [shape: bf16[128,128], index: 5, kind: input, shape index: {}]   ;;  %s813_s6 = inlined_call_operand.vmem [shape: f32[1,128], index: 6, kind: input, shape index: {}]   ;;  %s814_s7 = inlined_call_operand.vmem [shape: s32[16,1], index: 7, kind: input, shape index: {}]   ;;  %s815_s8 = inlined_call_operand.vmem [shape: f32[16,128], index: 8, kind: output, shape index: {}]  }
   0x1   :  { %14 = vsyncpa [#allocation6], 0  ;;  %s691_s27 = smov [#allocation5]   ;;  %s692_s29 = smov [#allocation3]  }
   0x2   :  { %s36_s28 = sshll.u32 %s691_s27, 4  ;;  %s22_s30 = sshll.u32 %s692_s29, 4  ;;  %s37_s28 = int_to_ptr.vmem [resolvable:$true] %s36_s28  ;;  %s23_s30 = int_to_ptr.vmem [resolvable:$true] %s22_s30 }
   0x3   :  { %s635_s9 = scalar_lea.vmem %s37_s28, 1024  ;;  %p640_p1 = scmp.lt.s32.totalorder %s37_s28, %s37_s28 }
   0x4   :  { %p636_p0 = scmp.ne.s32.totalorder %s37_s28, %s635_s9  ;;  %p641_p2 = scmp.lt.s32.totalorder %s635_s9, %s635_s9 }
   0x6   :  { %p642_p3 = por %p641_p2, %p640_p1 }
   0x8   :  { %p643_p4 = pnand %p642_p3, %p636_p0 }
   0xa   :  { %646 = shalt.err (!%p643_p4)
}
   0xb   :  { %s693_s10 = smov 64   ;;  %s694_s11 = smov 4  }
   0xc   :  { %42 = dma.hbm_to_vmem [thread:$0]  %s810_s3, 1024, %s37_s28, [#allocation6], %s693_s10, %s693_s10, %s694_s11  }
   0xd   :  { %s655_s14 = scalar_lea.vmem %s23_s30, 1024  ;;  %p660_p6 = scmp.lt.s32.totalorder %s23_s30, %s23_s30 }
   0xe   :  { %p656_p5 = scmp.ne.s32.totalorder %s23_s30, %s655_s14  ;;  %p661_p7 = scmp.lt.s32.totalorder %s655_s14, %s655_s14 }
  0x10   :  { %p662_p8 = por %p661_p7, %p660_p6 }
  0x12   :  { %p663_p9 = pnand %p662_p8, %p656_p5 }
  0x14   :  { %666 = shalt.err (!%p663_p9)
}
  0x15   :  { %28 = dma.hbm_to_vmem [thread:$0]  %s808_s1, 1024, %s23_s30, [#allocation4], %s693_s10, %s693_s10, %s694_s11  }
  0x16   :  { %s695_s17 = smov [#allocation7]  }
  0x17   :  { %s50_s18 = sshll.u32 %s695_s17, 4  ;;  %s51_s18 = int_to_ptr.vmem [resolvable:$true] %s50_s18 }
  0x18   :  { %s675_s19 = scalar_lea.vmem %s51_s18, 1024  ;;  %p680_p11 = scmp.lt.s32.totalorder %s51_s18, %s51_s18 }
  0x19   :  { %p676_p10 = scmp.ne.s32.totalorder %s51_s18, %s675_s19  ;;  %p681_p12 = scmp.lt.s32.totalorder %s675_s19, %s675_s19 }
  0x1b   :  { %p682_p13 = por %p681_p12, %p680_p11 }
  0x1d   :  { %p683_p0 = pnand %p682_p13, %p676_p10 }
  0x1f   :  { %686 = shalt.err (!%p683_p0)
}
  0x20   :  { %56 = dma.hbm_to_vmem [thread:$0]  %s812_s5, 1024, %s51_s18, [#allocation6], %s693_s10, %s693_s10, %s694_s11  }
  0x21   :  { %687 = dma.done.wait [#allocation4], 1024  }
  0x22   :  { %688 = vsyncadd [#allocation4], 4294966272 }
  0x23   :  { %689 = dma.done.wait [#allocation6], 2048  }
  0x24   :  { %690 = vsyncadd [#allocation6], 4294965248  ;;  %v696_v0 = vmov 0.0   ;;  %vm697_vm0 = vmmov 0   ;;  %v601_v1 = vld [vmem:[#allocation3 + $0x38] sm:$0xff]   ;;  %v602_v2 = vld [vmem:[#allocation3 + $0x30] sm:$0xff]   ;;  %v443_v50 = vlaneseq }
  0x25   :  { %532 = vmatprep.subr.bf16.mxu0 %v696_v0  ;;  %548 = vmatprep.mubr.msk.bf16.mxu0 %vm697_vm0, %v696_v0  ;;  %v603_v3 = vld [vmem:[#allocation3 + $0x28] sm:$0xff]   ;;  %v610_v4 = vld [vmem:[#allocation5 + $0x38] sm:$0xff]   ;;  %v604_v5 = vld [vmem:[#allocation3 + $0x20] sm:$0xff]   ;;  %v698_v37 = vmov 0  }
  0x26   :  { %552 = vmatprep.subr.bf16.mxu1 %v696_v0  ;;  %568 = vmatprep.mubr.msk.bf16.mxu1 %vm697_vm0, %v696_v0  ;;  %v611_v6 = vld [vmem:[#allocation5 + $0x30] sm:$0xff]   ;;  %v605_v7 = vld [vmem:[#allocation3 + $0x18] sm:$0xff]   ;;  %v612_v8 = vld [vmem:[#allocation5 + $0x28] sm:$0xff]   ;;  %v444_v51 = vand.u32 127, %v443_v50 }
  0x27   :  { %533 = vmatpush3.bf16.msra.mxu0 %v601_v1  ;;  %553 = vmatpush3.bf16.msra.mxu1 %v610_v4  ;;  %v606_v9 = vld [vmem:[#allocation3 + $0x10] sm:$0xff]   ;;  %v613_v10 = vld [vmem:[#allocation5 + $0x20] sm:$0xff]   ;;  %v607_v11 = vld [vmem:[#allocation3 + $0x8] sm:$0xff]  }
  0x28   :  { %534 = vmatprep.subr.bf16.mxu0 %v696_v0  ;;  %554 = vmatprep.subr.bf16.mxu1 %v696_v0  ;;  %v614_v12 = vld [vmem:[#allocation5 + $0x18] sm:$0xff]   ;;  %v608_v13 = vld [vmem:[#allocation3] sm:$0xff]   ;;  %v615_v15 = vld [vmem:[#allocation5 + $0x10] sm:$0xff]  }
  0x29   :  { %v609_v14 = vld [vmem:[%s807_s0] sm:$0xff]   ;;  %v616_v16 = vld [vmem:[#allocation5 + $0x8] sm:$0xff]   ;;  %v617_v17 = vld [vmem:[#allocation5] sm:$0xff]   ;;  %600 = vset.pattern.permute.xlu0 %v698_v37 }
  0x2a   :  { %v618_v18 = vld [vmem:[#allocation7 + $0x38] sm:$0xff]   ;;  %v619_v19 = vld [vmem:[#allocation7 + $0x30] sm:$0xff]   ;;  %v620_v20 = vld [vmem:[#allocation7 + $0x28] sm:$0xff]  }
  0x2b   :  { %535 = vmatpush3.bf16.msra.mxu0 %v602_v2  ;;  %555 = vmatpush3.bf16.msra.mxu1 %v611_v6  ;;  %v467_v21 = vld [vmem:[%s809_s2] ss:$0 sm:$0xff]  ;;  %v621_v31 = vld [vmem:[#allocation7 + $0x20] sm:$0xff]   ;;  %v623_v33 = vld [vmem:[#allocation7 + $0x10] sm:$0xff]  }
  0x2c   :  { %536 = vmatprep.subr.bf16.mxu0 %v696_v0  ;;  %556 = vmatprep.subr.bf16.mxu1 %v696_v0  ;;  %v622_v32 = vld [vmem:[#allocation7 + $0x18] sm:$0xff]   ;;  %v624_v34 = vld [vmem:[#allocation7 + $0x8] sm:$0xff]   ;;  %v625_v35 = vld [vmem:[#allocation7] sm:$0xff]  }
  0x2d   :  { %v447_v36 = vld [vmem:[%s814_s7] sm:$0xff]  ;;  %v448_v38 = vld [vmem:[%s814_s7 + $0x8] sm:$0xff] }
  0x2e   :  { %450 = vperm.xlu0 %600, %v447_v36   ;;  %v477_v39 = vld [vmem:[%s811_s4] ss:$0 sm:$0xff] }
  0x2f   :  { %537 = vmatpush3.bf16.msra.mxu0 %v603_v3  ;;  %557 = vmatpush3.bf16.msra.mxu1 %v612_v8  ;;  %v488_v53 = vld [vmem:[%s813_s6] ss:$0 sm:$0xff] }
  0x30   :  { %538 = vmatprep.subr.bf16.mxu0 %v696_v0  ;;  %558 = vmatprep.subr.bf16.mxu1 %v696_v0 }
  0x32   :  { %453 = vperm.xlu0 %600, %v448_v38  }
  0x33   :  { %539 = vmatpush3.bf16.msra.mxu0 %v604_v5  ;;  %559 = vmatpush3.bf16.msra.mxu1 %v613_v10 }
  0x34   :  { %540 = vmatprep.subr.bf16.mxu0 %v696_v0  ;;  %560 = vmatprep.subr.bf16.mxu1 %v696_v0 }
  0x37   :  { %541 = vmatpush3.bf16.msra.mxu0 %v605_v7  ;;  %561 = vmatpush3.bf16.msra.mxu1 %v614_v12 }
  0x38   :  { %542 = vmatprep.subr.bf16.mxu0 %v696_v0  ;;  %562 = vmatprep.subr.bf16.mxu1 %v696_v0 }
  0x3b   :  { %543 = vmatpush3.bf16.msra.mxu0 %v606_v9  ;;  %563 = vmatpush3.bf16.msra.mxu1 %v615_v15 }
  0x3c   :  { %544 = vmatprep.subr.bf16.mxu0 %v696_v0  ;;  %564 = vmatprep.subr.bf16.mxu1 %v696_v0 }
  0x3f   :  { %545 = vmatpush3.bf16.msra.mxu0 %v607_v11  ;;  %565 = vmatpush3.bf16.msra.mxu1 %v616_v16 }
  0x40   :  { %546 = vmatprep.subr.bf16.mxu0 %v696_v0  ;;  %566 = vmatprep.subr.bf16.mxu1 %v696_v0 }
  0x43   :  { %547 = vmatpush3.bf16.msra.mxu0 %v608_v13  ;;  %567 = vmatpush3.bf16.msra.mxu1 %v617_v17 }
  0x44   :  { %572 = vmatprep.subr.bf16.mxu0 %v696_v0 }
  0x46   :  { %549 = vmatmul.mubr.bf16.vlgmr.msra.gmra.mxu0 %v609_v14 }
  0x47   :  { %588 = vmatprep.mubr.msk.bf16.mxu0 %vm697_vm0, %v696_v0  ;;  %573 = vmatpush3.bf16.msra.mxu0 %v618_v18 }
  0x48   :  { %574 = vmatprep.subr.bf16.mxu0 %v696_v0 }
  0x4b   :  { %575 = vmatpush3.bf16.msra.mxu0 %v619_v19 }
  0x4c   :  { %576 = vmatprep.subr.bf16.mxu0 %v696_v0 }
  0x4f   :  { %577 = vmatpush3.bf16.msra.mxu0 %v620_v20 }
  0x50   :  { %578 = vmatprep.subr.bf16.mxu0 %v696_v0 }
  0x53   :  { %579 = vmatpush3.bf16.msra.mxu0 %v621_v31 }
  0x54   :  { %580 = vmatprep.subr.bf16.mxu0 %v696_v0 }
  0x57   :  { %581 = vmatpush3.bf16.msra.mxu0 %v622_v32 }
  0x58   :  { %582 = vmatprep.subr.bf16.mxu0 %v696_v0 }
  0x5b   :  { %583 = vmatpush3.bf16.msra.mxu0 %v623_v33 }
  0x5c   :  { %584 = vmatprep.subr.bf16.mxu0 %v696_v0 }
  0x5f   :  { %585 = vmatpush3.bf16.msra.mxu0 %v624_v34 }
  0x60   :  { %586 = vmatprep.subr.bf16.mxu0 %v696_v0 }
  0x63   :  { %587 = vmatpush3.bf16.msra.mxu0 %v625_v35 }
  0xa9   :  { %v451_v52 = vpop.permute.xlu0 %450 }
  0xaa   :  { %vm455_vm1 = vcmp.lt.s32.totalorder %v444_v51, %v451_v52 }
  0xad   :  { %v454_v58 = vpop.permute.xlu0 %453 }
  0xae   :  { %vm456_vm2 = vcmp.lt.s32.totalorder %v444_v51, %v454_v58 }
 0x106   :  { %v188_v22 = vpop.f32.mrf.mxu0 }
 0x107   :  { %v189_v24 = vadd.f32 %v467_v21, %v188_v22 }
 0x108   :  { %v550_v23 = vpop.f32.mrf.mxu0 }
 0x109   :  { %v195_v28 = vmax.f32 %v189_v24, 0.0 }
 0x10a   :  { %v191_v25 = vpop.f32.mrf.mxu0 }
 0x10b   :  { %v192_v26 = vadd.f32 %v467_v21, %v191_v25 }
 0x10c   :  { %v551_v27 = vpop.f32.mrf.mxu0 }
 0x10d   :  { %v196_v29 = vmax.f32 %v192_v26, 0.0 }
 0x10f   :  { %v197_v30 = vpack.c.bf16 %v196_v29, %v195_v28 }
 0x111   :  { %569 = vmatmul.mubr.bf16.vlgmr.msra.gmra.mxu1 %v197_v30 }
 0x1d1   :  { %v303_v40 = vpop.f32.mrf.mxu1 }
 0x1d2   :  { %v304_v42 = vadd.f32 %v477_v39, %v303_v40 }
 0x1d3   :  { %v570_v41 = vpop.f32.mrf.mxu1 }
 0x1d4   :  { %v310_v46 = vmax.f32 %v304_v42, 0.0 }
 0x1d5   :  { %v306_v43 = vpop.f32.mrf.mxu1 }
 0x1d6   :  { %v307_v44 = vadd.f32 %v477_v39, %v306_v43 }
 0x1d7   :  { %v571_v45 = vpop.f32.mrf.mxu1 }
 0x1d8   :  { %v311_v47 = vmax.f32 %v307_v44, 0.0 }
 0x1da   :  { %v503_v48 = vpack.c.bf16 %v311_v47, %v310_v46 }
 0x1dc   :  { %504 = vst [vmem:[#allocation2] sm:$0xff] %v503_v48  }
 0x1e3   :  { %v626_v49 = vld [vmem:[#allocation2] sm:$0xff]  }
 0x1e4   :  { %589 = vmatmul.mubr.bf16.vlgmr.msra.gmra.mxu0 %v626_v49 }
 0x2a4   :  { %v435_v54 = vpop.f32.mrf.mxu0 }
 0x2a5   :  { %v436_v55 = vadd.f32 %v488_v53, %v435_v54 }
 0x2a6   :  { %v590_v56 = vpop.f32.mrf.mxu0 }
 0x2a7   :  { %v457_v57 = vsel %vm455_vm1, %v436_v55, 0.0 }
 0x2a8   :  { %459 = vst [vmem:[%s815_s8] sm:$0xff] %v457_v57  ;;  %v438_v59 = vpop.f32.mrf.mxu0 }
 0x2a9   :  { %v439_v60 = vadd.f32 %v488_v53, %v438_v59 }
 0x2aa   :  { %v591_v61 = vpop.f32.mrf.mxu0 }
 0x2ab   :  { %v458_v62 = vsel %vm456_vm2, %v439_v60, 0.0 }
 0x2ac   :  { %460 = vst [vmem:[%s815_s8 + $0x8] sm:$0xff] %v458_v62 }
 0x2ad   :  { %465 = vsyncpa [#allocation4], 1 }
 0x2ae   :  { %466 = vsyncpa [#allocation6], 1 }

</bundles_post_ra>
